<compile_context>
chip_gen: v7x
topology: tpu7x:2x2x1
jax: 0.10.0
libtpu: 0.0.40
codegen_flags: <defaults>
</compile_context>

<pallas_src>
import math

import jax
import jax.numpy as jnp
from jax.experimental import pallas as pl
from jax.experimental.pallas import tpu as pltpu


def _cn_kernel(x_ref, gamma_ref, beta_ref, o_ref):
    # Elementwise conditional-normalization hot path: x * gamma + beta.
    # Upcast to f32 for the FMA (safe no-op for f32 inputs; avoids poor bf16
    # lowering on v5e), cast back on store.
    x = x_ref[...].astype(jnp.float32)
    g = gamma_ref[...].astype(jnp.float32)
    b = beta_ref[...].astype(jnp.float32)
    o_ref[...] = (x * g + b).astype(o_ref.dtype)


def _round_up(v, m):
    return ((v + m - 1) // m) * m


def cn_layer(x, gamma, beta, *, lanes=1024, max_tile_rows=512):
    """Apply conditional normalization: x * gamma + beta.

    x, gamma, beta: NCHW arrays of identical shape (matches CNLayer where the
    parameter shape equals the input shape).
    """
    assert x.ndim == 4, "CN layer must have 4-dimensional shape"
    assert gamma.shape == x.shape and beta.shape == x.shape

    orig_shape = x.shape
    total = math.prod(orig_shape)

    # Lane-dense 2-D view: last dim is a big multiple of 128 regardless of H*W.
    lanes = max(128, _round_up(min(lanes, total), 128))
    rows = pl.cdiv(total, lanes)
    # Tile rows: multiple of 8 (sublane), capped so a (tile_rows, lanes) f32
    # tile stays ~2 MiB -> 16 MiB total with 4 arrays double-buffered.
    tile_rows = min(max_tile_rows, _round_up(rows, 8))
    padded_rows = _round_up(rows, tile_rows)
    padded_total = padded_rows * lanes

    def to2d(a):
        flat = a.reshape(-1)
        if padded_total != total:
            flat = jnp.pad(flat, (0, padded_total - total))
        return flat.reshape(padded_rows, lanes)

    x2, g2, b2 = to2d(x), to2d(gamma), to2d(beta)

    grid = (padded_rows // tile_rows,)
    spec = pl.BlockSpec((tile_rows, lanes), lambda i: (i, 0))

    out2 = pl.pallas_call(
        _cn_kernel,
        out_shape=jax.ShapeDtypeStruct((padded_rows, lanes), x.dtype),
        grid=grid,
        in_specs=[spec, spec, spec],
        out_specs=spec,
        compiler_params=pltpu.CompilerParams(
            # Shard the row-tile axis across both TensorCores on v7x; harmless
            # single-core no-op on v5e/v6e.
            dimension_semantics=("parallel",),
            # 16 MiB working set + headroom; fits v7x's 64 MiB physical VMEM
            # and raises v5e's 16 MiB default scoped limit.
            vmem_limit_bytes=32 * 1024 * 1024,
        ),
    )(x2, g2, b2)

    return out2.reshape(-1)[:total].reshape(orig_shape)


if __name__ == "__main__":
    # Small NCHW example consistent with the module.
    N, C, H, W = 2, 4, 16, 16
    shape = (N, C, H, W)

    key = jax.random.PRNGKey(0)
    kx, kg, kb = jax.random.split(key, 3)
    x = jax.random.normal(kx, shape, dtype=jnp.float32)

    # Deterministic parameters mirroring CNLayer.__init__ (gamma=ones,
    # beta=zeros), perturbed slightly so the affine transform is non-trivial
    # but still deterministic.
    gamma = jnp.ones(shape, dtype=jnp.float32) + 0.1 * jax.random.normal(
        kg, shape, dtype=jnp.float32
    )
    beta = jnp.zeros(shape, dtype=jnp.float32) + 0.1 * jax.random.normal(
        kb, shape, dtype=jnp.float32
    )

    out = cn_layer(x, gamma, beta)
    out = jax.block_until_ready(out)

    # Reference check in plain JAX.
    ref = x * gamma + beta
    assert out.shape == shape
    assert jnp.allclose(out, ref, atol=1e-6, rtol=1e-6)

    print("KERNEL_OK")
</pallas_src>

<mosaic_0001>
module attributes {stable_mosaic.version = 11 : i64} {
  func.func @_cn_kernel(%arg0: i32, %arg1: memref<8x1024xf32, #tpu.memory_space<vmem>>, %arg2: memref<8x1024xf32, #tpu.memory_space<vmem>>, %arg3: memref<8x1024xf32, #tpu.memory_space<vmem>>, %arg4: memref<8x1024xf32, #tpu.memory_space<vmem>>) attributes {dimension_semantics = [#tpu.dimension_semantics<parallel>], iteration_bounds = array<i64: 1>, scalar_prefetch = 0 : i64, scratch_operands = 0 : i64, tpu.core_type = #tpu.core_type<tc>, window_params = [{transform_indices = @transform_0, window_bounds = array<i64: 8, 1024>}, {transform_indices = @transform_1, window_bounds = array<i64: 8, 1024>}, {transform_indices = @transform_2, window_bounds = array<i64: 8, 1024>}, {transform_indices = @transform_3, window_bounds = array<i64: 8, 1024>}]} {
    %c0 = arith.constant 0 : index
    %c0_0 = arith.constant 0 : index
    %0 = vector.load %arg1[%c0, %c0_0] : memref<8x1024xf32, #tpu.memory_space<vmem>>, vector<8x1024xf32>
    %c0_1 = arith.constant 0 : index
    %c0_2 = arith.constant 0 : index
    %1 = vector.load %arg2[%c0_1, %c0_2] : memref<8x1024xf32, #tpu.memory_space<vmem>>, vector<8x1024xf32>
    %c0_3 = arith.constant 0 : index
    %c0_4 = arith.constant 0 : index
    %2 = vector.load %arg3[%c0_3, %c0_4] : memref<8x1024xf32, #tpu.memory_space<vmem>>, vector<8x1024xf32>
    %3 = arith.mulf %0, %1 : vector<8x1024xf32>
    %4 = arith.addf %3, %2 : vector<8x1024xf32>
    %c0_5 = arith.constant 0 : index
    %c0_6 = arith.constant 0 : index
    %5 = vector.load %arg4[%c0_5, %c0_6] : memref<8x1024xf32, #tpu.memory_space<vmem>>, vector<8x1024xf32>
    tpu.vector_store %arg4[%c0_5, %c0_6], %4 {strides = array<i32>} : memref<8x1024xf32, #tpu.memory_space<vmem>>, vector<8x1024xf32>,
    return
  }
  func.func @transform_0(%arg0: i32) -> (i32, i32) {
    %c0_i32 = arith.constant 0 : i32
    %c0_i32_0 = arith.constant 0 : i32
    return %arg0, %c0_i32 : i32, i32
  }
  func.func @transform_1(%arg0: i32) -> (i32, i32) {
    %c0_i32 = arith.constant 0 : i32
    %c0_i32_0 = arith.constant 0 : i32
    return %arg0, %c0_i32 : i32, i32
  }
  func.func @transform_2(%arg0: i32) -> (i32, i32) {
    %c0_i32 = arith.constant 0 : i32
    %c0_i32_0 = arith.constant 0 : i32
    return %arg0, %c0_i32 : i32, i32
  }
  func.func @transform_3(%arg0: i32) -> (i32, i32) {
    %c0_i32 = arith.constant 0 : i32
    %c0_i32_0 = arith.constant 0 : i32
    return %arg0, %c0_i32 : i32, i32
  }
}

</mosaic_0001>

<bundles_post_ra>
// kernel: tpu_custom_call.1
= control target key start
LH: loop header
LB: loop body
LE: loop exit
PB: predicated region body
PF: predicated region fallthrough
CT: control target
= control target key end

     0   :  { %8 = vsyncpa [#allocation3], 0  ;;  %s284_s0 = inlined_call_operand.hbm [shape: f32[8,1024], index: 0, kind: input, shape index: {}]   ;;  %s285_s1 = inlined_call_operand.hbm [shape: f32[8,1024], index: 1, kind: input, shape index: {}]   ;;  %s286_s2 = inlined_call_operand.hbm [shape: f32[8,1024], index: 2, kind: input, shape index: {}]   ;;  %s287_s3 = inlined_call_operand.hbm [shape: f32[8,1024], index: 3, kind: output, shape index: {}]  }
   0x1   :  { %9 = vsyncpa [#allocation6], 0 }
   0x2   :  { %10 = vsyncpa [#allocation4], 0  ;;  %s212_s12 = smov [#allocation5]   ;;  %s213_s14 = smov [#allocation2]  }
   0x3   :  { %s27_s13 = sshll.u32 %s212_s12, 4  ;;  %s17_s15 = sshll.u32 %s213_s14, 4  ;;  %s28_s13 = int_to_ptr.vmem [resolvable:$true] %s27_s13  ;;  %s18_s15 = int_to_ptr.vmem [resolvable:$true] %s17_s15 }
   0x4   :  { %s118_s18 = scalar_lea.hbm %s285_s1, 1024 }
   0x5   :  { %p119_p0 = scmp.ne.s32.totalorder %s285_s1, %s118_s18  ;;  %p122_p1 = scmp.lt.u32.totalorder %s118_s18, %s285_s1 }
   0x7   :  { %p124_p2 = pnand %p122_p1, %p119_p0 }
   0x9   :  { %127 = shalt.err (!%p124_p2)
}
   0xa   :  { %s128_s23 = scalar_lea.vmem %s28_s13, 1024  ;;  %p133_p4 = scmp.lt.s32.totalorder %s28_s13, %s28_s13 }
   0xb   :  { %p129_p3 = scmp.ne.s32.totalorder %s28_s13, %s128_s23  ;;  %p134_p5 = scmp.lt.s32.totalorder %s128_s23, %s128_s23 }
   0xd   :  { %p135_p6 = por %p134_p5, %p133_p4 }
   0xf   :  { %p136_p7 = pnand %p135_p6, %p129_p3 }
  0x11   :  { %139 = shalt.err (!%p136_p7)
}
  0x12   :  { %30 = dma.hbm_to_vmem [thread:$0]  %s285_s1, 1024, %s28_s13, [#allocation6]  }
  0x13   :  { %s140_s28 = scalar_lea.hbm %s284_s0, 1024 }
  0x14   :  { %p141_p8 = scmp.ne.s32.totalorder %s284_s0, %s140_s28  ;;  %p144_p9 = scmp.lt.u32.totalorder %s140_s28, %s284_s0 }
  0x16   :  { %p146_p10 = pnand %p144_p9, %p141_p8 }
  0x18   :  { %149 = shalt.err (!%p146_p10)
}
  0x19   :  { %s150_s6 = scalar_lea.vmem %s18_s15, 1024  ;;  %p155_p12 = scmp.lt.s32.totalorder %s18_s15, %s18_s15 }
  0x1a   :  { %p151_p11 = scmp.ne.s32.totalorder %s18_s15, %s150_s6  ;;  %p156_p13 = scmp.lt.s32.totalorder %s150_s6, %s150_s6 }
  0x1c   :  { %p157_p0 = por %p156_p13, %p155_p12 }
  0x1e   :  { %p158_p1 = pnand %p157_p0, %p151_p11 }
  0x20   :  { %161 = shalt.err (!%p158_p1)
}
  0x21   :  { %20 = dma.hbm_to_vmem [thread:$0]  %s284_s0, 1024, %s18_s15, [#allocation3]  }
  0x22   :  { %s214_s8 = smov [#allocation7]   ;;  %s162_s12 = scalar_lea.hbm %s286_s2, 1024 }
  0x23   :  { %s37_s9 = sshll.u32 %s214_s8, 4  ;;  %p163_p2 = scmp.ne.s32.totalorder %s286_s2, %s162_s12  ;;  %s38_s9 = int_to_ptr.vmem [resolvable:$true] %s37_s9 }
  0x24   :  { %p166_p3 = scmp.lt.u32.totalorder %s162_s12, %s286_s2 }
  0x26   :  { %p168_p4 = pnand %p166_p3, %p163_p2 }
  0x28   :  { %171 = shalt.err (!%p168_p4)
}
  0x29   :  { %s172_s18 = scalar_lea.vmem %s38_s9, 1024  ;;  %p177_p6 = scmp.lt.s32.totalorder %s38_s9, %s38_s9 }
  0x2a   :  { %p173_p5 = scmp.ne.s32.totalorder %s38_s9, %s172_s18  ;;  %p178_p7 = scmp.lt.s32.totalorder %s172_s18, %s172_s18 }
  0x2c   :  { %p179_p8 = por %p178_p7, %p177_p6 }
  0x2e   :  { %p180_p9 = pnand %p179_p8, %p173_p5 }
  0x30   :  { %183 = shalt.err (!%p180_p9)
}
  0x31   :  { %40 = dma.hbm_to_vmem [thread:$0]  %s286_s2, 1024, %s38_s9, [#allocation6]  }
  0x32   :  { %206 = dma.done.wait [#allocation3], 1024  }
  0x33   :  { %207 = vsyncadd [#allocation3], 4294966272 }
  0x34   :  { %208 = dma.done.wait [#allocation6], 2048  }
  0x35   :  { %209 = vsyncadd [#allocation6], 4294965248  ;;  %v50_v0 = vld [vmem:[#allocation2] sm:$0xff]  ;;  %v51_v4 = vld [vmem:[#allocation2 + $0x8] sm:$0xff]  ;;  %s215_s2 = smov [#allocation8]  }
  0x36   :  { %v58_v1 = vld [vmem:[#allocation5] sm:$0xff]  ;;  %v59_v5 = vld [vmem:[#allocation5 + $0x8] sm:$0xff]  ;;  %v52_v8 = vld [vmem:[#allocation2 + $0x10] sm:$0xff]  ;;  %s104_s19 = sshll.u32 %s215_s2, 4  ;;  %s105_s19 = int_to_ptr.vmem [resolvable:$true] %s104_s19 }
  0x37   :  { %v66_v2 = vld [vmem:[#allocation7] sm:$0xff]  ;;  %v74_v3 = vmul.f32 %v58_v1, %v50_v0  ;;  %v67_v6 = vld [vmem:[#allocation7 + $0x8] sm:$0xff]  ;;  %v75_v7 = vmul.f32 %v59_v5, %v51_v4  ;;  %v60_v9 = vld [vmem:[#allocation5 + $0x10] sm:$0xff]  ;;  %s184_s20 = scalar_lea.vmem %s105_s19, 1024  ;;  %p189_p11 = scmp.lt.s32.totalorder %s105_s19, %s105_s19 }
  0x38   :  { %v68_v10 = vld [vmem:[#allocation7 + $0x10] sm:$0xff]  ;;  %v76_v12 = vmul.f32 %v60_v9, %v52_v8  ;;  %v53_v13 = vld [vmem:[#allocation2 + $0x18] sm:$0xff]  ;;  %v54_v18 = vld [vmem:[#allocation2 + $0x20] sm:$0xff]  ;;  %p185_p10 = scmp.ne.s32.totalorder %s105_s19, %s184_s20  ;;  %p190_p12 = scmp.lt.s32.totalorder %s184_s20, %s184_s20 }
  0x39   :  { %v82_v11 = vadd.f32 %v74_v3, %v66_v2  ;;  %v61_v14 = vld [vmem:[#allocation5 + $0x18] sm:$0xff]  ;;  %v83_v16 = vadd.f32 %v75_v7, %v67_v6  ;;  %v62_v19 = vld [vmem:[#allocation5 + $0x20] sm:$0xff]  ;;  %v55_v23 = vld [vmem:[#allocation2 + $0x28] sm:$0xff] }
  0x3a   :  { %v69_v15 = vld [vmem:[#allocation7 + $0x18] sm:$0xff]  ;;  %v77_v17 = vmul.f32 %v61_v14, %v53_v13  ;;  %v70_v20 = vld [vmem:[#allocation7 + $0x20] sm:$0xff]  ;;  %v84_v21 = vadd.f32 %v76_v12, %v68_v10  ;;  %v78_v22 = vmul.f32 %v62_v19, %v54_v18  ;;  %v63_v24 = vld [vmem:[#allocation5 + $0x28] sm:$0xff]  ;;  %p191_p13 = por %p190_p12, %p189_p11 }
  0x3b   :  { %90 = vst [vmem:[#allocation8] sm:$0xff] %v82_v11  ;;  %v71_v25 = vld [vmem:[#allocation7 + $0x28] sm:$0xff]  ;;  %91 = vst [vmem:[#allocation8 + $0x8] sm:$0xff] %v83_v16  ;;  %v79_v27 = vmul.f32 %v63_v24, %v55_v23  ;;  %v56_v28 = vld [vmem:[#allocation2 + $0x30] sm:$0xff] }
  0x3c   :  { %v85_v26 = vadd.f32 %v77_v17, %v69_v15  ;;  %v64_v29 = vld [vmem:[#allocation5 + $0x30] sm:$0xff]  ;;  %92 = vst [vmem:[#allocation8 + $0x10] sm:$0xff] %v84_v21  ;;  %v86_v31 = vadd.f32 %v78_v22, %v70_v20  ;;  %v57_v33 = vld [vmem:[#allocation2 + $0x38] sm:$0xff]  ;;  %p192_p0 = pnand %p191_p13, %p185_p10 }
  0x3d   :  { %v72_v30 = vld [vmem:[#allocation7 + $0x30] sm:$0xff]  ;;  %v80_v32 = vmul.f32 %v64_v29, %v56_v28  ;;  %v65_v34 = vld [vmem:[#allocation5 + $0x38] sm:$0xff]  ;;  %v87_v36 = vadd.f32 %v79_v27, %v71_v25 }
  0x3e   :  { %v73_v35 = vld [vmem:[#allocation7 + $0x38] sm:$0xff]  ;;  %93 = vst [vmem:[#allocation8 + $0x18] sm:$0xff] %v85_v26  ;;  %v81_v37 = vmul.f32 %v65_v34, %v57_v33  ;;  %94 = vst [vmem:[#allocation8 + $0x20] sm:$0xff] %v86_v31 }
  0x3f   :  { %v88_v38 = vadd.f32 %v80_v32, %v72_v30  ;;  %95 = vst [vmem:[#allocation8 + $0x28] sm:$0xff] %v87_v36 }
  0x40   :  { %v89_v39 = vadd.f32 %v81_v37, %v73_v35 }
  0x41   :  { %96 = vst [vmem:[#allocation8 + $0x30] sm:$0xff] %v88_v38 }
  0x42   :  { %97 = vst [vmem:[#allocation8 + $0x38] sm:$0xff] %v89_v39 }
  0x43   :  { %195 = shalt.err (!%p192_p0)
}
  0x44   :  { %s196_s23 = scalar_lea.hbm %s287_s3, 1024 }
  0x45   :  { %p197_p1 = scmp.ne.s32.totalorder %s287_s3, %s196_s23  ;;  %p200_p2 = scmp.lt.u32.totalorder %s196_s23, %s287_s3 }
  0x47   :  { %p202_p3 = pnand %p200_p2, %p197_p1 }
  0x49   :  { %205 = shalt.err (!%p202_p3)
}
  0x4a   :  { %107 = dma.vmem_to_hbm [thread:$0]  %s105_s19, 1024, %s287_s3, [#allocation4]  }
  0x4b   :  { %210 = dma.done.wait [#allocation4], 1024  }
  0x4c   :  { %211 = vsyncadd [#allocation4], 4294966272 }
  0x4d   :  { %111 = vsyncpa [#allocation3], 1 }
  0x4e   :  { %112 = vsyncpa [#allocation6], 1 }
  0x4f   :  { %113 = vsyncpa [#allocation4], 1 }

</bundles_post_ra>
